<compile_context>
chip_gen: v6e
topology: v6e:2x2x1
jax: 0.10.0
libtpu: 0.0.40
codegen_flags: <defaults>
</compile_context>

<pallas_src>
import jax
import jax.numpy as jnp
from jax.experimental import pallas as pl
from jax.experimental.pallas import tpu as pltpu


def _classifier_kernel(x_ref, w_ref, b_ref, o_ref):
    # x_ref: (TILE_M, H) VMEM (native dtype)   w_ref: (1, H) VMEM f32 (resident)
    # b_ref: (1,) SMEM scalar f32              o_ref: (TILE_M, 1) VMEM
    x = x_ref[...].astype(jnp.float32)                       # per-tile upcast (VPU)
    w = w_ref[...]                                           # (1, H) broadcast over rows
    logits = jnp.sum(x * w, axis=-1, keepdims=True) + b_ref[0]   # VPU mul + XLU reduce
    o_ref[...] = jax.nn.sigmoid(logits).astype(o_ref.dtype)      # EUP


def _vmem_capacity_bytes():
    try:
        return int(pltpu.get_tpu_info().vmem_capacity_bytes)
    except Exception:
        return 64 * 1024 * 1024          # conservative (v7x-sized) fallback


def _sublane_multiple(itemsize):
    # Sub-32-bit dtypes pack along sublanes.
    return {4: 8, 2: 16, 1: 32}.get(itemsize, 8)


def _pick_tile_m(m, hidden, itemsize, per_buffer_bytes):
    """Biggest row tile whose single input buffer fits the byte budget,
    rounded to the sublane multiple and capped by the (rounded-up) row count."""
    sub = _sublane_multiple(itemsize)
    bytes_per_row = max(1, hidden * itemsize)
    rows_by_budget = max(sub, (per_buffer_bytes // bytes_per_row) // sub * sub)
    m_rounded = pl.cdiv(m, sub) * sub
    return min(rows_by_budget, m_rounded)


def classifier_forward(x, weight, bias, *, tile_m=None):
    """x: (batch, seq, hidden); weight: (1, hidden) (torch Linear layout);
    bias: (1,).  Returns (batch, seq) sigmoid probabilities (x.dtype)."""
    batch, seq, hidden = x.shape
    m = batch * seq
    x_itemsize = jnp.dtype(x.dtype).itemsize

    x2d = x.reshape(m, hidden)                            # contiguous reshape: no copy
    w = weight.reshape(1, hidden).astype(jnp.float32)     # lane-dense weight row (tiny)
    b = bias.reshape(1).astype(jnp.float32)               # scalar -> SMEM

    capacity = _vmem_capacity_bytes()
    per_buffer = capacity // 8                            # 16 MiB v5e/v6e, 8 MiB v7x

    if tile_m is None:
        tile_m = _pick_tile_m(m, hidden, x_itemsize, per_buffer)
    else:
        sub = _sublane_multiple(x_itemsize)
        tile_m = max(sub, (int(tile_m) // sub) * sub)

    grid = (pl.cdiv(m, tile_m),)                          # ragged last tile handled by Pallas

    out_dtype = x.dtype
    out_itemsize = jnp.dtype(out_dtype).itemsize
    x_buf_bytes = tile_m * hidden * x_itemsize
    vmem_limit = max(
        32 * 1024 * 1024,
        min(2 * x_buf_bytes + 2 * hidden * 4 + 2 * tile_m * out_itemsize + (1 << 20),
            3 * capacity // 4),
    )

    cost = pl.CostEstimate(
        flops=2 * m * hidden,
        transcendentals=m,                                # one sigmoid per row
        bytes_accessed=m * hidden * x_itemsize + m * out_itemsize + hidden * 4 + 4,
    )

    out = pl.pallas_call(
        _classifier_kernel,
        out_shape=jax.ShapeDtypeStruct((m, 1), out_dtype),
        grid_spec=pltpu.PrefetchScalarGridSpec(
            num_scalar_prefetch=0,
            grid=grid,
            in_specs=[
                pl.BlockSpec((tile_m, hidden), lambda i: (i, 0)),     # streamed x tiles
                pl.BlockSpec((1, hidden), lambda i: (0, 0)),          # resident weight
                pl.BlockSpec(memory_space=pltpu.MemorySpace.SMEM),    # scalar bias
            ],
            out_specs=pl.BlockSpec((tile_m, 1), lambda i: (i, 0)),
        ),
        compiler_params=pltpu.CompilerParams(
            dimension_semantics=("parallel",),
            vmem_limit_bytes=vmem_limit,
        ),
        cost_estimate=cost,
    )(x2d, w, b)

    return out[:, 0].reshape(batch, seq)


def _reference(x, weight, bias):
    xf = x.astype(jnp.float32)
    return jax.nn.sigmoid(
        jnp.einsum("bsh,oh->bso", xf, weight.astype(jnp.float32))
        + bias.astype(jnp.float32)
    ).squeeze(-1)


if __name__ == "__main__":
    key = jax.random.PRNGKey(0)

    # --- small shape consistent with the module (batch=2, seq=8, hidden=32) ---
    k_x, k_w, k_b, key = jax.random.split(key, 4)
    batch, seq, hidden = 2, 8, 32
    bound = 1.0 / (hidden ** 0.5)
    x = jax.random.normal(k_x, (batch, seq, hidden), dtype=jnp.float32)
    weight = jax.random.uniform(k_w, (1, hidden), dtype=jnp.float32,
                                minval=-bound, maxval=bound)
    bias = jax.random.uniform(k_b, (1,), dtype=jnp.float32,
                              minval=-bound, maxval=bound)

    y = classifier_forward(x, weight, bias)
    jax.block_until_ready(y)
    ref = _reference(x, weight, bias)
    assert y.shape == (batch, seq)
    assert jnp.allclose(y, ref, atol=1e-5, rtol=1e-5)

    # --- larger shape: ragged M (no host-side padding), single big tile ---
    k_x2, k_w2, k_b2, key = jax.random.split(key, 4)
    batch2, seq2, hidden2 = 3, 700, 128                  # M = 2100 (not a tile multiple)
    bound2 = 1.0 / (hidden2 ** 0.5)
    x2 = jax.random.normal(k_x2, (batch2, seq2, hidden2), dtype=jnp.float32)
    weight2 = jax.random.uniform(k_w2, (1, hidden2), dtype=jnp.float32,
                                 minval=-bound2, maxval=bound2)
    bias2 = jax.random.uniform(k_b2, (1,), dtype=jnp.float32,
                               minval=-bound2, maxval=bound2)

    y2 = classifier_forward(x2, weight2, bias2)
    jax.block_until_ready(y2)
    ref2 = _reference(x2, weight2, bias2)
    assert y2.shape == (batch2, seq2)
    assert jnp.allclose(y2, ref2, atol=1e-5, rtol=1e-5)

    # --- same shape, forced small tile: multi-tile streaming + ragged last tile ---
    y3 = classifier_forward(x2, weight2, bias2, tile_m=512)   # grid = cdiv(2100, 512) = 5
    jax.block_until_ready(y3)
    assert jnp.allclose(y3, ref2, atol=1e-5, rtol=1e-5)

    # --- bf16 activations: native-dtype streaming + in-kernel f32 upcast ---
    x2_bf16 = x2.astype(jnp.bfloat16)
    y4 = classifier_forward(x2_bf16, weight2, bias2)
    jax.block_until_ready(y4)
    ref4 = _reference(x2_bf16, weight2, bias2)
    assert y4.shape == (batch2, seq2)
    assert jnp.allclose(y4.astype(jnp.float32), ref4, atol=2e-2, rtol=2e-2)

    print("KERNEL_OK")
</pallas_src>

<mosaic_0001>
module attributes {stable_mosaic.version = 11 : i64} {
  func.func @_classifier_kernel(%arg0: i32, %arg1: memref<16x32xf32, #tpu.memory_space<vmem>>, %arg2: memref<1x32xf32, #tpu.memory_space<vmem>>, %arg3: memref<1xf32, #tpu.memory_space<smem>>, %arg4: memref<16x1xf32, #tpu.memory_space<vmem>>) attributes {dimension_semantics = [#tpu.dimension_semantics<parallel>], iteration_bounds = array<i64: 1>, scalar_prefetch = 0 : i64, scratch_operands = 0 : i64, tpu.core_type = #tpu.core_type<tc>, window_params = [{transform_indices = @transform_0, window_bounds = array<i64: 16, 32>}, {pipeline_mode = #tpu.pipeline_mode<synchronous>, transform_indices = @transform_1, window_bounds = array<i64: 1, 32>}, {transform_indices = @transform_2, window_bounds = array<i64: 1>}, {transform_indices = @transform_3, window_bounds = array<i64: 16, 1>}]} {
    %c0 = arith.constant 0 : index
    %c0_0 = arith.constant 0 : index
    %0 = vector.load %arg1[%c0, %c0_0] : memref<16x32xf32, #tpu.memory_space<vmem>>, vector<16x32xf32>
    %c0_1 = arith.constant 0 : index
    %c0_2 = arith.constant 0 : index
    %1 = vector.load %arg2[%c0_1, %c0_2] : memref<1x32xf32, #tpu.memory_space<vmem>>, vector<1x32xf32>
    %2 = vector.broadcast %1 : vector<1x32xf32> to vector<16x32xf32>
    %3 = arith.mulf %0, %2 : vector<16x32xf32>
    %cst = arith.constant dense<0.000000e+00> : vector<16xf32>
    %4 = vector.multi_reduction <add>, %3, %cst [1] : vector<16x32xf32> to vector<16xf32>
    %5 = vector.shape_cast %4 : vector<16xf32> to vector<16x1xf32>
    %c0_3 = arith.constant 0 : index
    %6 = memref.load %arg3[%c0_3] : memref<1xf32, #tpu.memory_space<smem>>
    %7 = vector.broadcast %6 : f32 to vector<16x1xf32>
    %8 = arith.addf %5, %7 : vector<16x1xf32>
    %9 = arith.negf %8 : vector<16x1xf32>
    %10 = math.exp %9 : vector<16x1xf32>
    %cst_4 = arith.constant 1.000000e+00 : f32
    %11 = vector.broadcast %cst_4 : f32 to vector<16x1xf32>
    %12 = arith.addf %11, %10 : vector<16x1xf32>
    %13 = arith.divf %11, %12 : vector<16x1xf32>
    %c0_5 = arith.constant 0 : index
    %c0_6 = arith.constant 0 : index
    %14 = vector.load %arg4[%c0_5, %c0_6] : memref<16x1xf32, #tpu.memory_space<vmem>>, vector<16x1xf32>
    tpu.vector_store %arg4[%c0_5, %c0_6], %13 {strides = array<i32>} : memref<16x1xf32, #tpu.memory_space<vmem>>, vector<16x1xf32>,
    return
  }
  func.func @transform_0(%arg0: i32) -> (i32, i32) {
    %c0_i32 = arith.constant 0 : i32
    %c0_i32_0 = arith.constant 0 : i32
    return %arg0, %c0_i32 : i32, i32
  }
  func.func @transform_1(%arg0: i32) -> (i32, i32) {
    %c0_i32 = arith.constant 0 : i32
    %c0_i32_0 = arith.constant 0 : i32
    %c0_i32_1 = arith.constant 0 : i32
    return %c0_i32, %c0_i32_0 : i32, i32
  }
  func.func @transform_2(%arg0: i32) -> i32 {
    %c0_i32 = arith.constant 0 : i32
    %c0_i32_0 = arith.constant 0 : i32
    return %c0_i32 : i32
  }
  func.func @transform_3(%arg0: i32) -> (i32, i32) {
    %c0_i32 = arith.constant 0 : i32
    %c0_i32_0 = arith.constant 0 : i32
    return %arg0, %c0_i32 : i32, i32
  }
}

</mosaic_0001>

<bundles_post_ra>
// kernel: tpu_custom_call.1
= control target key start
LH: loop header
LB: loop body
LE: loop exit
PB: predicated region body
PF: predicated region fallthrough
CT: control target
= control target key end

     0   :  { %9 = vsyncpa [#allocation4], 0  ;;  %s107_s12 = smov [#allocation3]   ;;  %s145_s0 = inlined_call_operand.hbm [shape: f32[16,32], index: 0, kind: input, shape index: {}]   ;;  %s146_s1 = inlined_call_operand.vmem [shape: f32[1,32], index: 1, kind: input, shape index: {}]   ;;  %s147_s2 = inlined_call_operand.<no memory space> [shape: f32[1], index: 2, kind: input, shape index: {}]   ;;  %s148_s3 = inlined_call_operand.vmem [shape: f32[16,1], index: 3, kind: output, shape index: {}]  }
   0x1   :  { %s15_s13 = sshll.u32 %s107_s12, 4  ;;  %s16_s13 = int_to_ptr.vmem [resolvable:$true] %s15_s13 }
   0x2   :  { %s93_s14 = scalar_lea.vmem %s16_s13, 256  ;;  %p98_p1 = scmp.lt.s32.totalorder %s16_s13, %s16_s13 }
   0x3   :  { %p94_p0 = scmp.ne.s32.totalorder %s16_s13, %s93_s14  ;;  %p99_p2 = scmp.lt.s32.totalorder %s93_s14, %s93_s14 }
   0x5   :  { %p100_p3 = por %p99_p2, %p98_p1 }
   0x7   :  { %p101_p4 = pnand %p100_p3, %p94_p0 }
   0x9   :  { %104 = shalt.err (!%p101_p4)
}
   0xa   :  { %s108_s15 = smov 128   ;;  %s109_s16 = smov 8  }
   0xb   :  { %21 = dma.hbm_to_vmem [thread:$0]  %s145_s0, 256, %s16_s13, [#allocation4], %s108_s15, %s108_s15, %s109_s16  }
   0xc   :  { %105 = dma.done.wait [#allocation4], 256  }
   0xd   :  { %106 = vsyncadd [#allocation4], 4294967040  ;;  %v29_v0 = vld [vmem:[#allocation3] sm:$0xff]  ;;  %vm40_vm0 = vcmask 261120   ;;  %v30_v2 = vld [vmem:[#allocation3 + $0x8] sm:$0xff]  ;;  %v48_v7 = vstv %s147_s2  ;;  %vm63_vm1 = vcmask 7168  }
   0xe   :  { %v71_v1 = vld [vmem:[%s146_s1] ss:$0 sm:$0xff] }
   0xf   :  { %v38_v3 = vmul.f32 %v71_v1, %v29_v0  ;;  %v39_v4 = vmul.f32 %v71_v1, %v30_v2 }
  0x11   :  { %v41_v5 = vsel %vm40_vm0, %v38_v3, 0.0  ;;  %v44_v6 = vsel %vm40_vm0, %v39_v4, 0.0 }
  0x12   :  { %42 = vadd.xlane.f32.xlu0 %v41_v5 }
  0x16   :  { %45 = vadd.xlane.f32.xlu0 %v44_v6 }
  0x9b   :  { %v43_v8 = vpop.xlane.xlu0 %42 }
  0x9c   :  { %v49_v9 = vadd.f32 %v48_v7, %v43_v8 }
  0x9e   :  { %v72_v10 = vmul.f32 -1.442695, %v49_v9 }
  0x9f   :  { %v46_v11 = vpop.xlane.xlu0 %45 }
  0xa0   :  { %77 = vpow2.f32 %v72_v10  ;;  %v50_v12 = vadd.f32 %v48_v7, %v46_v11 }
  0xa2   :  { %v73_v13 = vmul.f32 -1.442695, %v50_v12 }
  0xa4   :  { %79 = vpow2.f32 %v73_v13 }
  0xad   :  { %v78_v14 = vpop.eup %77 }
  0xae   :  { %v57_v15 = vadd.f32 1.0, %v78_v14 }
  0xb0   :  { %81 = vrcp.f32 %v57_v15 }
  0xb1   :  { %v80_v16 = vpop.eup %79 }
  0xb2   :  { %v58_v17 = vadd.f32 1.0, %v80_v16 }
  0xb4   :  { %83 = vrcp.f32 %v58_v17 }
  0xbd   :  { %v82_v18 = vpop.eup %81 }
  0xbe   :  { %64 = vst.msk [vmem:[%s148_s3] sm:$0xff] %vm63_vm1, %v82_v18 }
  0xc1   :  { %v84_v19 = vpop.eup %83 }
  0xc2   :  { %65 = vst.msk [vmem:[%s148_s3 + $0x8] sm:$0xff] %vm63_vm1, %v84_v19 }
  0xc3   :  { %70 = vsyncpa [#allocation4], 1 }

</bundles_post_ra>
